<compile_context>
chip_gen: v6e
topology: v6e:2x2x1
jax: 0.10.0
libtpu: 0.0.40
codegen_flags: <defaults>
</compile_context>

<pallas_src>
import functools

import jax
import jax.numpy as jnp
import numpy as np
from jax.experimental import pallas as pl
from jax.experimental.pallas import tpu as pltpu


# --------------------------------------------------------------------------
# Host-side, ONE-TIME preparation (kernel-layout weights & boundary masks)
# --------------------------------------------------------------------------
def _make_tap_masks(batch, height, width):
    """(9, N) 0/1 masks, N = batch*height*width laid out (b, h, w).

    mask[t, p] == 1 iff the 3x3 'same'-padding tap t = di*3+dj of destination
    position p is in-bounds (so the wrapped value produced by a lane rotation
    must be kept); 0 where the padded conv reads an implicit zero.
    """
    s = height * width
    n = batch * s
    p = np.arange(n)
    h = (p % s) // width
    w = p % width
    masks = np.zeros((9, n), np.float32)
    for di in range(3):
        for dj in range(3):
            t = di * 3 + dj
            hh = h + di - 1
            ww = w + dj - 1
            valid = (hh >= 0) & (hh < height) & (ww >= 0) & (ww < width)
            masks[t] = valid.astype(np.float32)
    return jnp.asarray(masks)


def prepare_kernel_params(params, batch, height, width):
    """Re-layout torch-style params into kernel form (done once, not per step)."""
    conv = []
    for w, bias in [params["conv_in"], *params["cnns"]]:
        cout, cin = w.shape[0], w.shape[1]
        # (Cout, Cin, 3, 3) -> (Cout, 3, 3, Cin) -> (Cout, 9*Cin); column t*Cin+ci
        w_col = jnp.transpose(w, (0, 2, 3, 1)).reshape(cout, 9 * cin)
        conv.append((w_col.astype(jnp.bfloat16),
                     bias.reshape(cout, 1).astype(jnp.float32)))
    (w1, b1), (w2, b2) = params["ffs"]
    w3, b3 = params["out"]
    board = w3.shape[0]
    padded_board = ((board + 127) // 128) * 128        # lane-dense output store
    w3t = jnp.zeros((w3.shape[1], padded_board), jnp.float32).at[:, :board].set(w3.T)
    b3p = jnp.zeros((1, padded_board), jnp.float32).at[:, :board].set(b3.reshape(1, -1))
    return {
        "masks": _make_tap_masks(batch, height, width),     # (9, N) f32, O(N)
        "conv": conv,                                       # list of (w_col bf16, bias f32)
        "w1t": w1.T.astype(jnp.bfloat16), "b1": b1.reshape(1, -1).astype(jnp.float32),
        "w2t": w2.T.astype(jnp.bfloat16), "b2": b2.reshape(1, -1).astype(jnp.float32),
        "w3t": w3t.astype(jnp.bfloat16), "b3": b3p,
    }


# --------------------------------------------------------------------------
# Fused Pallas kernel
# --------------------------------------------------------------------------
def _fused_forward_kernel(*refs, cnn_depth, batch, width):
    """refs = [x0, masks, (w_col, bias) x (1+cnn_depth),
               w1t, b1, w2t, b2, w3t, b3, out, col_scratch, xflat_scratch]."""
    f32 = jnp.float32
    bf16 = jnp.bfloat16

    x0_ref, masks_ref = refs[0], refs[1]
    n_conv = cnn_depth + 1
    conv_refs = refs[2:2 + 2 * n_conv]
    (w1t_ref, b1_ref, w2t_ref, b2_ref, w3t_ref, b3_ref) = \
        refs[2 + 2 * n_conv:2 + 2 * n_conv + 6]
    out_ref, col_ref, xflat_ref = refs[-3], refs[-2], refs[-1]

    n = x0_ref.shape[1]            # N = B*H*W, the lane axis of every conv tensor
    s = n // batch                 # H*W per image

    x = x0_ref[...]                # (1, N) f32, lanes ordered (b, h, w)

    # ---- conv stack ------------------------------------------------------
    # Per layer: 8 XLU rolls + VPU boundary masks build the im2col block in a
    # VMEM scratch, then a single MXU matmul (Cout, 9*Cin) x (9*Cin, N).
    for layer in range(n_conv):
        w_ref = conv_refs[2 * layer]        # (Cout, 9*Cin)  bf16
        b_ref = conv_refs[2 * layer + 1]    # (Cout, 1)      f32
        cout, cin9 = w_ref.shape
        cin = cin9 // 9
        for t in range(9):
            di, dj = t // 3, t % 3
            delta = (di - 1) * width + (dj - 1)          # src lane = dst lane + delta
            if delta == 0:
                tap = x                                  # centre tap: identity, always valid
            else:
                rolled = pltpu.roll(x, shift=(-delta) % n, axis=1)   # XLU rotation
                tap = rolled * masks_ref[t:t + 1, :]                 # VPU zero-mask (f32)
            col_ref[t * cin:(t + 1) * cin, :] = tap
        col = col_ref[0:cin9, :].astype(bf16)                        # (9*Cin, N) bf16
        acc = jnp.dot(w_ref[...], col, preferred_element_type=f32)   # ONE MXU op / layer
        x = jnp.maximum(acc + b_ref[...], 0.0)                       # bias + ReLU in f32

    # ---- flatten to torch order (B, Cch*S) via a tiny VMEM relayout ------
    cch = x.shape[0]
    for b in range(batch):
        for c in range(cch):
            xflat_ref[b:b + 1, c * s:(c + 1) * s] = x[c:c + 1, b * s:(b + 1) * s]
    xflat = xflat_ref[...].astype(bf16)                              # (B, Cch*S)

    # ---- FF stack: 3 whole-batch matmuls, f32 accumulation ---------------
    hid = jnp.dot(xflat, w1t_ref[...], preferred_element_type=f32) + b1_ref[...]
    hid = jnp.maximum(hid, 0.0)
    hid = jnp.dot(hid.astype(bf16), w2t_ref[...], preferred_element_type=f32) + b2_ref[...]
    hid = jnp.maximum(hid, 0.0)
    logits = jnp.dot(hid.astype(bf16), w3t_ref[...], preferred_element_type=f32) + b3_ref[...]

    # single lane-dense (128-padded) store
    out_ref[...] = logits.astype(out_ref.dtype)


@jax.jit
def minesweeper_cnn_forward(state, kparams):
    """state: (B, H, W) float32 -> (B, board_size) logits (one fused kernel)."""
    b, hh, ww = state.shape
    board = hh * ww
    n = b * board
    x0 = state.reshape(1, n).astype(jnp.float32)          # lanes ordered (b, h, w)

    conv_flat = [a for pair in kparams["conv"] for a in pair]
    cnn_depth = len(kparams["conv"]) - 1
    n_channels = kparams["conv"][-1][0].shape[0]
    padded_board = kparams["w3t"].shape[1]

    inputs = [x0, kparams["masks"], *conv_flat,
              kparams["w1t"], kparams["b1"], kparams["w2t"], kparams["b2"],
              kparams["w3t"], kparams["b3"]]

    # Advisory cost estimate (tiny here, matters when the config scales up).
    flops = 2 * n * sum(int(w.shape[0]) * int(w.shape[1]) for w, _ in kparams["conv"])
    flops += 2 * b * (int(kparams["w1t"].shape[0]) * int(kparams["w1t"].shape[1])
                      + int(kparams["w2t"].shape[0]) * int(kparams["w2t"].shape[1])
                      + int(kparams["w3t"].shape[0]) * int(kparams["w3t"].shape[1]))
    bytes_accessed = int(sum(int(np.prod(a.shape)) * a.dtype.itemsize for a in inputs)
                         + b * padded_board * 4)

    kernel = functools.partial(_fused_forward_kernel,
                               cnn_depth=cnn_depth, batch=b, width=ww)

    out = pl.pallas_call(
        kernel,
        out_shape=jax.ShapeDtypeStruct((b, padded_board), jnp.float32),
        in_specs=[pl.BlockSpec(memory_space=pltpu.MemorySpace.VMEM)] * len(inputs),
        out_specs=pl.BlockSpec(memory_space=pltpu.MemorySpace.VMEM),
        scratch_shapes=[
            pltpu.VMEM((9 * n_channels, n), jnp.float32),          # im2col block
            pltpu.VMEM((b, n_channels * board), jnp.float32),      # torch-order flatten
        ],
        compiler_params=pltpu.CompilerParams(vmem_limit_bytes=16 * 1024 * 1024),
        cost_estimate=pl.CostEstimate(flops=flops, transcendentals=0,
                                      bytes_accessed=bytes_accessed),
    )(*inputs)
    return out[:, :board]                      # drop lane padding outside the kernel


# --------------------------- parameters (synthetic) --------------------------
def _init_linear(kw, kb, out_f, in_f):
    lim = 1.0 / (in_f ** 0.5)
    w = jax.random.uniform(kw, (out_f, in_f), jnp.float32, -lim, lim)
    b = jax.random.uniform(kb, (out_f,), jnp.float32, -lim, lim)
    return w, b


def _init_conv(kw, kb, cout, cin):
    fan_in = cin * 9
    lim = 1.0 / (fan_in ** 0.5)
    w = jax.random.uniform(kw, (cout, cin, 3, 3), jnp.float32, -lim, lim)
    b = jax.random.uniform(kb, (cout,), jnp.float32, -lim, lim)
    return w, b


def init_params(key, n_channels, cnn_depth, ff_dim, board_size):
    n_layers = 1 + cnn_depth + 3
    keys = iter(jax.random.split(key, 2 * n_layers))
    params = {}
    params["conv_in"] = _init_conv(next(keys), next(keys), n_channels, 1)
    params["cnns"] = [
        _init_conv(next(keys), next(keys), n_channels, n_channels)
        for _ in range(cnn_depth)
    ]
    params["ffs"] = [
        _init_linear(next(keys), next(keys), ff_dim, n_channels * board_size),
        _init_linear(next(keys), next(keys), ff_dim, ff_dim),
    ]
    params["out"] = _init_linear(next(keys), next(keys), board_size, ff_dim)
    return params


# ------------------------------ pure-JAX reference ---------------------------
def reference_forward(state, params):
    x = state[:, None, :, :]

    def conv(x, w, b):
        y = jax.lax.conv_general_dilated(
            x, w, (1, 1), "SAME", dimension_numbers=("NCHW", "OIHW", "NCHW"))
        return jax.nn.relu(y + b[None, :, None, None])

    x = conv(x, *params["conv_in"])
    for w, b in params["cnns"]:
        x = conv(x, w, b)
    x = x.reshape(x.shape[0], -1)
    for w, b in params["ffs"]:
        x = jax.nn.relu(x @ w.T + b)
    w, b = params["out"]
    return x @ w.T + b


if __name__ == "__main__":
    B, H, W = 2, 8, 8                     # 8x8 board -> board_size = 64
    board_size = H * W
    n_channels, cnn_depth, ff_dim = 4, 2, 32

    key = jax.random.PRNGKey(0)
    k_state, k_params = jax.random.split(key)
    state = jax.random.uniform(k_state, (B, H, W), jnp.float32)
    params = init_params(k_params, n_channels, cnn_depth, ff_dim, board_size)
    kparams = prepare_kernel_params(params, B, H, W)   # one-time weight prep

    out = minesweeper_cnn_forward(state, kparams)
    out = jax.block_until_ready(out)
    assert out.shape == (B, board_size), out.shape

    ref = reference_forward(state, params)
    assert jnp.allclose(out, ref, rtol=2e-2, atol=2e-2), (
        float(jnp.max(jnp.abs(out - ref))))

    print("KERNEL_OK")
</pallas_src>

<mosaic_0001>
module attributes {stable_mosaic.version = 11 : i64} {
  func.func @_fused_forward_kernel(%arg0: memref<1x128xf32, #tpu.memory_space<vmem>>, %arg1: memref<9x128xf32, #tpu.memory_space<vmem>>, %arg2: memref<4x9xbf16, #tpu.memory_space<vmem>>, %arg3: memref<4x1xf32, #tpu.memory_space<vmem>>, %arg4: memref<4x36xbf16, #tpu.memory_space<vmem>>, %arg5: memref<4x1xf32, #tpu.memory_space<vmem>>, %arg6: memref<4x36xbf16, #tpu.memory_space<vmem>>, %arg7: memref<4x1xf32, #tpu.memory_space<vmem>>, %arg8: memref<256x32xbf16, #tpu.memory_space<vmem>>, %arg9: memref<1x32xf32, #tpu.memory_space<vmem>>, %arg10: memref<32x32xbf16, #tpu.memory_space<vmem>>, %arg11: memref<1x32xf32, #tpu.memory_space<vmem>>, %arg12: memref<32x128xbf16, #tpu.memory_space<vmem>>, %arg13: memref<1x128xf32, #tpu.memory_space<vmem>>, %arg14: memref<2x128xf32, #tpu.memory_space<vmem>>, %arg15: memref<36x128xf32, #tpu.memory_space<vmem>>, %arg16: memref<2x256xf32, #tpu.memory_space<vmem>>) attributes {dimension_semantics = [], scalar_prefetch = 0 : i64, scratch_operands = 2 : i64, tpu.core_type = #tpu.core_type<tc>} {
    %c0 = arith.constant 0 : index
    %c0_0 = arith.constant 0 : index
    %0 = vector.load %arg0[%c0, %c0_0] : memref<1x128xf32, #tpu.memory_space<vmem>>, vector<1x128xf32>
    %c9_i32 = arith.constant 9 : i32
    %1 = tpu.dynamic_rotate %0 by %c9_i32 dim 1 : vector<1x128xf32>, i32 -> vector<1x128xf32>
    %c0_1 = arith.constant 0 : index
    %c0_2 = arith.constant 0 : index
    %2 = vector.load %arg1[%c0_1, %c0_2] : memref<9x128xf32, #tpu.memory_space<vmem>>, vector<1x128xf32>
    %3 = arith.mulf %1, %2 : vector<1x128xf32>
    %c0_3 = arith.constant 0 : index
    %c0_4 = arith.constant 0 : index
    %4 = vector.load %arg15[%c0_3, %c0_4] : memref<36x128xf32, #tpu.memory_space<vmem>>, vector<1x128xf32>
    tpu.vector_store %arg15[%c0_3, %c0_4], %3 {strides = array<i32>} : memref<36x128xf32, #tpu.memory_space<vmem>>, vector<1x128xf32>,
    %c8_i32 = arith.constant 8 : i32
    %5 = tpu.dynamic_rotate %0 by %c8_i32 dim 1 : vector<1x128xf32>, i32 -> vector<1x128xf32>
    %c1 = arith.constant 1 : index
    %c0_5 = arith.constant 0 : index
    %6 = vector.load %arg1[%c1, %c0_5] : memref<9x128xf32, #tpu.memory_space<vmem>>, vector<1x128xf32>
    %7 = arith.mulf %5, %6 : vector<1x128xf32>
    %c1_6 = arith.constant 1 : index
    %c0_7 = arith.constant 0 : index
    %8 = vector.load %arg15[%c1_6, %c0_7] : memref<36x128xf32, #tpu.memory_space<vmem>>, vector<1x128xf32>
    tpu.vector_store %arg15[%c1_6, %c0_7], %7 {strides = array<i32>} : memref<36x128xf32, #tpu.memory_space<vmem>>, vector<1x128xf32>,
    %c7_i32 = arith.constant 7 : i32
    %9 = tpu.dynamic_rotate %0 by %c7_i32 dim 1 : vector<1x128xf32>, i32 -> vector<1x128xf32>
    %c2 = arith.constant 2 : index
    %c0_8 = arith.constant 0 : index
    %10 = vector.load %arg1[%c2, %c0_8] : memref<9x128xf32, #tpu.memory_space<vmem>>, vector<1x128xf32>
    %11 = arith.mulf %9, %10 : vector<1x128xf32>
    %c2_9 = arith.constant 2 : index
    %c0_10 = arith.constant 0 : index
    %12 = vector.load %arg15[%c2_9, %c0_10] : memref<36x128xf32, #tpu.memory_space<vmem>>, vector<1x128xf32>
    tpu.vector_store %arg15[%c2_9, %c0_10], %11 {strides = array<i32>} : memref<36x128xf32, #tpu.memory_space<vmem>>, vector<1x128xf32>,
    %c1_i32 = arith.constant 1 : i32
    %13 = tpu.dynamic_rotate %0 by %c1_i32 dim 1 : vector<1x128xf32>, i32 -> vector<1x128xf32>
    %c3 = arith.constant 3 : index
    %c0_11 = arith.constant 0 : index
    %14 = vector.load %arg1[%c3, %c0_11] : memref<9x128xf32, #tpu.memory_space<vmem>>, vector<1x128xf32>
    %15 = arith.mulf %13, %14 : vector<1x128xf32>
    %c3_12 = arith.constant 3 : index
    %c0_13 = arith.constant 0 : index
    %16 = vector.load %arg15[%c3_12, %c0_13] : memref<36x128xf32, #tpu.memory_space<vmem>>, vector<1x128xf32>
    tpu.vector_store %arg15[%c3_12, %c0_13], %15 {strides = array<i32>} : memref<36x128xf32, #tpu.memory_space<vmem>>, vector<1x128xf32>,
    %c4 = arith.constant 4 : index
    %c0_14 = arith.constant 0 : index
    %17 = vector.load %arg15[%c4, %c0_14] : memref<36x128xf32, #tpu.memory_space<vmem>>, vector<1x128xf32>
    tpu.vector_store %arg15[%c4, %c0_14], %0 {strides = array<i32>} : memref<36x128xf32, #tpu.memory_space<vmem>>, vector<1x128xf32>,
    %c127_i32 = arith.constant 127 : i32
    %18 = tpu.dynamic_rotate %0 by %c127_i32 dim 1 : vector<1x128xf32>, i32 -> vector<1x128xf32>
    %c5 = arith.constant 5 : index
    %c0_15 = arith.constant 0 : index
    %19 = vector.load %arg1[%c5, %c0_15] : memref<9x128xf32, #tpu.memory_space<vmem>>, vector<1x128xf32>
    %20 = arith.mulf %18, %19 : vector<1x128xf32>
    %c5_16 = arith.constant 5 : index
    %c0_17 = arith.constant 0 : index
    %21 = vector.load %arg15[%c5_16, %c0_17] : memref<36x128xf32, #tpu.memory_space<vmem>>, vector<1x128xf32>
    tpu.vector_store %arg15[%c5_16, %c0_17], %20 {strides = array<i32>} : memref<36x128xf32, #tpu.memory_space<vmem>>, vector<1x128xf32>,
    %c121_i32 = arith.constant 121 : i32
    %22 = tpu.dynamic_rotate %0 by %c121_i32 dim 1 : vector<1x128xf32>, i32 -> vector<1x128xf32>
    %c6 = arith.constant 6 : index
    %c0_18 = arith.constant 0 : index
    %23 = vector.load %arg1[%c6, %c0_18] : memref<9x128xf32, #tpu.memory_space<vmem>>, vector<1x128xf32>
    %24 = arith.mulf %22, %23 : vector<1x128xf32>
    %c6_19 = arith.constant 6 : index
    %c0_20 = arith.constant 0 : index
    %25 = vector.load %arg15[%c6_19, %c0_20] : memref<36x128xf32, #tpu.memory_space<vmem>>, vector<1x128xf32>
    tpu.vector_store %arg15[%c6_19, %c0_20], %24 {strides = array<i32>} : memref<36x128xf32, #tpu.memory_space<vmem>>, vector<1x128xf32>,
    %c120_i32 = arith.constant 120 : i32
    %26 = tpu.dynamic_rotate %0 by %c120_i32 dim 1 : vector<1x128xf32>, i32 -> vector<1x128xf32>
    %c7 = arith.constant 7 : index
    %c0_21 = arith.constant 0 : index
    %27 = vector.load %arg1[%c7, %c0_21] : memref<9x128xf32, #tpu.memory_space<vmem>>, vector<1x128xf32>
    %28 = arith.mulf %26, %27 : vector<1x128xf32>
    %c7_22 = arith.constant 7 : index
    %c0_23 = arith.constant 0 : index
    %29 = vector.load %arg15[%c7_22, %c0_23] : memref<36x128xf32, #tpu.memory_space<vmem>>, vector<1x128xf32>
    tpu.vector_store %arg15[%c7_22, %c0_23], %28 {strides = array<i32>} : memref<36x128xf32, #tpu.memory_space<vmem>>, vector<1x128xf32>,
    %c119_i32 = arith.constant 119 : i32
    %30 = tpu.dynamic_rotate %0 by %c119_i32 dim 1 : vector<1x128xf32>, i32 -> vector<1x128xf32>
    %c8 = arith.constant 8 : index
    %c0_24 = arith.constant 0 : index
    %31 = vector.load %arg1[%c8, %c0_24] : memref<9x128xf32, #tpu.memory_space<vmem>>, vector<1x128xf32>
    %32 = arith.mulf %30, %31 : vector<1x128xf32>
    %c8_25 = arith.constant 8 : index
    %c0_26 = arith.constant 0 : index
    %33 = vector.load %arg15[%c8_25, %c0_26] : memref<36x128xf32, #tpu.memory_space<vmem>>, vector<1x128xf32>
    tpu.vector_store %arg15[%c8_25, %c0_26], %32 {strides = array<i32>} : memref<36x128xf32, #tpu.memory_space<vmem>>, vector<1x128xf32>,
    %c0_27 = arith.constant 0 : index
    %c0_28 = arith.constant 0 : index
    %34 = vector.load %arg15[%c0_27, %c0_28] : memref<36x128xf32, #tpu.memory_space<vmem>>, vector<9x128xf32>
    %35 = arith.truncf %34 : vector<9x128xf32> to vector<9x128xbf16>
    %c0_29 = arith.constant 0 : index
    %c0_30 = arith.constant 0 : index
    %36 = vector.load %arg2[%c0_29, %c0_30] : memref<4x9xbf16, #tpu.memory_space<vmem>>, vector<4x9xbf16>
    %cst = arith.constant dense<0.000000e+00> : vector<4x128xf32>
    %37 = tpu.matmul %36, %35, %cst {dimension_numbers = #tpu.dot_dimension_numbers<[1], [0], [0], [1], [0, 0, 1, 1], [], []>} : vector<4x9xbf16>, vector<9x128xbf16>, vector<4x128xf32> -> vector<4x128xf32>
    %c0_31 = arith.constant 0 : index
    %c0_32 = arith.constant 0 : index
    %38 = vector.load %arg3[%c0_31, %c0_32] : memref<4x1xf32, #tpu.memory_space<vmem>>, vector<4x1xf32>
    %39 = vector.broadcast %38 : vector<4x1xf32> to vector<4x128xf32>
    %40 = arith.addf %37, %39 : vector<4x128xf32>
    %cst_33 = arith.constant 0.000000e+00 : f32
    %41 = vector.broadcast %cst_33 : f32 to vector<4x128xf32>
    %42 = arith.maximumf %40, %41 : vector<4x128xf32>
    %c9_i32_34 = arith.constant 9 : i32
    %43 = tpu.dynamic_rotate %42 by %c9_i32_34 dim 1 : vector<4x128xf32>, i32 -> vector<4x128xf32>
    %c0_35 = arith.constant 0 : index
    %c0_36 = arith.constant 0 : index
    %44 = vector.load %arg1[%c0_35, %c0_36] : memref<9x128xf32, #tpu.memory_space<vmem>>, vector<1x128xf32>
    %45 = vector.broadcast %44 : vector<1x128xf32> to vector<4x128xf32>
    %46 = arith.mulf %43, %45 : vector<4x128xf32>
    %c0_37 = arith.constant 0 : index
    %c0_38 = arith.constant 0 : index
    %47 = vector.load %arg15[%c0_37, %c0_38] : memref<36x128xf32, #tpu.memory_space<vmem>>, vector<4x128xf32>
    tpu.vector_store %arg15[%c0_37, %c0_38], %46 {strides = array<i32>} : memref<36x128xf32, #tpu.memory_space<vmem>>, vector<4x128xf32>,
    %c8_i32_39 = arith.constant 8 : i32
    %48 = tpu.dynamic_rotate %42 by %c8_i32_39 dim 1 : vector<4x128xf32>, i32 -> vector<4x128xf32>
    %c1_40 = arith.constant 1 : index
    %c0_41 = arith.constant 0 : index
    %49 = vector.load %arg1[%c1_40, %c0_41] : memref<9x128xf32, #tpu.memory_space<vmem>>, vector<1x128xf32>
    %50 = vector.broadcast %49 : vector<1x128xf32> to vector<4x128xf32>
    %51 = arith.mulf %48, %50 : vector<4x128xf32>
    %c4_42 = arith.constant 4 : index
    %c0_43 = arith.constant 0 : index
    %52 = vector.load %arg15[%c4_42, %c0_43] : memref<36x128xf32, #tpu.memory_space<vmem>>, vector<4x128xf32>
    tpu.vector_store %arg15[%c4_42, %c0_43], %51 {strides = array<i32>} : memref<36x128xf32, #tpu.memory_space<vmem>>, vector<4x128xf32>,
    %c7_i32_44 = arith.constant 7 : i32
    %53 = tpu.dynamic_rotate %42 by %c7_i32_44 dim 1 : vector<4x128xf32>, i32 -> vector<4x128xf32>
    %c2_45 = arith.constant 2 : index
    %c0_46 = arith.constant 0 : index
    %54 = vector.load %arg1[%c2_45, %c0_46] : memref<9x128xf32, #tpu.memory_space<vmem>>, vector<1x128xf32>
    %55 = vector.broadcast %54 : vector<1x128xf32> to vector<4x128xf32>
    %56 = arith.mulf %53, %55 : vector<4x128xf32>
    %c8_47 = arith.constant 8 : index
    %c0_48 = arith.constant 0 : index
    %57 = vector.load %arg15[%c8_47, %c0_48] : memref<36x128xf32, #tpu.memory_space<vmem>>, vector<4x128xf32>
    tpu.vector_store %arg15[%c8_47, %c0_48], %56 {strides = array<i32>} : memref<36x128xf32, #tpu.memory_space<vmem>>, vector<4x128xf32>,
    %c1_i32_49 = arith.constant 1 : i32
    %58 = tpu.dynamic_rotate %42 by %c1_i32_49 dim 1 : vector<4x128xf32>, i32 -> vector<4x128xf32>
    %c3_50 = arith.constant 3 : index
    %c0_51 = arith.constant 0 : index
    %59 = vector.load %arg1[%c3_50, %c0_51] : memref<9x128xf32, #tpu.memory_space<vmem>>, vector<1x128xf32>
    %60 = vector.broadcast %59 : vector<1x128xf32> to vector<4x128xf32>
    %61 = arith.mulf %58, %60 : vector<4x128xf32>
    %c12 = arith.constant 12 : index
    %c0_52 = arith.constant 0 : index
    %62 = vector.load %arg15[%c12, %c0_52] : memref<36x128xf32, #tpu.memory_space<vmem>>, vector<4x128xf32>
    tpu.vector_store %arg15[%c12, %c0_52], %61 {strides = array<i32>} : memref<36x128xf32, #tpu.memory_space<vmem>>, vector<4x128xf32>,
    %c16 = arith.constant 16 : index
    %c0_53 = arith.constant 0 : index
    %63 = vector.load %arg15[%c16, %c0_53] : memref<36x128xf32, #tpu.memory_space<vmem>>, vector<4x128xf32>
    tpu.vector_store %arg15[%c16, %c0_53], %42 {strides = array<i32>} : memref<36x128xf32, #tpu.memory_space<vmem>>, vector<4x128xf32>,
    %c127_i32_54 = arith.constant 127 : i32
    %64 = tpu.dynamic_rotate %42 by %c127_i32_54 dim 1 : vector<4x128xf32>, i32 -> vector<4x128xf32>
    %c5_55 = arith.constant 5 : index
    %c0_56 = arith.constant 0 : index
    %65 = vector.load %arg1[%c5_55, %c0_56] : memref<9x128xf32, #tpu.memory_space<vmem>>, vector<1x128xf32>
    %66 = vector.broadcast %65 : vector<1x128xf32> to vector<4x128xf32>
    %67 = arith.mulf %64, %66 : vector<4x128xf32>
    %c20 = arith.constant 20 : index
    %c0_57 = arith.constant 0 : index
    %68 = vector.load %arg15[%c20, %c0_57] : memref<36x128xf32, #tpu.memory_space<vmem>>, vector<4x128xf32>
    tpu.vector_store %arg15[%c20, %c0_57], %67 {strides = array<i32>} : memref<36x128xf32, #tpu.memory_space<vmem>>, vector<4x128xf32>,
    %c121_i32_58 = arith.constant 121 : i32
    %69 = tpu.dynamic_rotate %42 by %c121_i32_58 dim 1 : vector<4x128xf32>, i32 -> vector<4x128xf32>
    %c6_59 = arith.constant 6 : index
    %c0_60 = arith.constant 0 : index
    %70 = vector.load %arg1[%c6_59, %c0_60] : memref<9x128xf32, #tpu.memory_space<vmem>>, vector<1x128xf32>
    %71 = vector.broadcast %70 : vector<1x128xf32> to vector<4x128xf32>
    %72 = arith.mulf %69, %71 : vector<4x128xf32>
    %c24 = arith.constant 24 : index
    %c0_61 = arith.constant 0 : index
    %73 = vector.load %arg15[%c24, %c0_61] : memref<36x128xf32, #tpu.memory_space<vmem>>, vector<4x128xf32>
    tpu.vector_store %arg15[%c24, %c0_61], %72 {strides = array<i32>} : memref<36x128xf32, #tpu.memory_space<vmem>>, vector<4x128xf32>,
    %c120_i32_62 = arith.constant 120 : i32
    %74 = tpu.dynamic_rotate %42 by %c120_i32_62 dim 1 : vector<4x128xf32>, i32 -> vector<4x128xf32>
    %c7_63 = arith.constant 7 : index
    %c0_64 = arith.constant 0 : index
    %75 = vector.load %arg1[%c7_63, %c0_64] : memref<9x128xf32, #tpu.memory_space<vmem>>, vector<1x128xf32>
    %76 = vector.broadcast %75 : vector<1x128xf32> to vector<4x128xf32>
    %77 = arith.mulf %74, %76 : vector<4x128xf32>
    %c28 = arith.constant 28 : index
    %c0_65 = arith.constant 0 : index
    %78 = vector.load %arg15[%c28, %c0_65] : memref<36x128xf32, #tpu.memory_space<vmem>>, vector<4x128xf32>
    tpu.vector_store %arg15[%c28, %c0_65], %77 {strides = array<i32>} : memref<36x128xf32, #tpu.memory_space<vmem>>, vector<4x128xf32>,
    %c119_i32_66 = arith.constant 119 : i32
    %79 = tpu.dynamic_rotate %42 by %c119_i32_66 dim 1 : vector<4x128xf32>, i32 -> vector<4x128xf32>
    %c8_67 = arith.constant 8 : index
    %c0_68 = arith.constant 0 : index
    %80 = vector.load %arg1[%c8_67, %c0_68] : memref<9x128xf32, #tpu.memory_space<vmem>>, vector<1x128xf32>
    %81 = vector.broadcast %80 : vector<1x128xf32> to vector<4x128xf32>
    %82 = arith.mulf %79, %81 : vector<4x128xf32>
    %c32 = arith.constant 32 : index
    %c0_69 = arith.constant 0 : index
    %83 = vector.load %arg15[%c32, %c0_69] : memref<36x128xf32, #tpu.memory_space<vmem>>, vector<4x128xf32>
    tpu.vector_store %arg15[%c32, %c0_69], %82 {strides = array<i32>} : memref<36x128xf32, #tpu.memory_space<vmem>>, vector<4x128xf32>,
    %c0_70 = arith.constant 0 : index
    %c0_71 = arith.constant 0 : index
    %84 = vector.load %arg15[%c0_70, %c0_71] : memref<36x128xf32, #tpu.memory_space<vmem>>, vector<36x128xf32>
    %85 = arith.truncf %84 : vector<36x128xf32> to vector<36x128xbf16>
    %c0_72 = arith.constant 0 : index
    %c0_73 = arith.constant 0 : index
    %86 = vector.load %arg4[%c0_72, %c0_73] : memref<4x36xbf16, #tpu.memory_space<vmem>>, vector<4x36xbf16>
    %cst_74 = arith.constant dense<0.000000e+00> : vector<4x128xf32>
    %87 = tpu.matmul %86, %85, %cst_74 {dimension_numbers = #tpu.dot_dimension_numbers<[1], [0], [0], [1], [0, 0, 1, 1], [], []>} : vector<4x36xbf16>, vector<36x128xbf16>, vector<4x128xf32> -> vector<4x128xf32>
    %c0_75 = arith.constant 0 : index
    %c0_76 = arith.constant 0 : index
    %88 = vector.load %arg5[%c0_75, %c0_76] : memref<4x1xf32, #tpu.memory_space<vmem>>, vector<4x1xf32>
    %89 = vector.broadcast %88 : vector<4x1xf32> to vector<4x128xf32>
    %90 = arith.addf %87, %89 : vector<4x128xf32>
    %cst_77 = arith.constant 0.000000e+00 : f32
    %91 = vector.broadcast %cst_77 : f32 to vector<4x128xf32>
    %92 = arith.maximumf %90, %91 : vector<4x128xf32>
    %c9_i32_78 = arith.constant 9 : i32
    %93 = tpu.dynamic_rotate %92 by %c9_i32_78 dim 1 : vector<4x128xf32>, i32 -> vector<4x128xf32>
    %c0_79 = arith.constant 0 : index
    %c0_80 = arith.constant 0 : index
    %94 = vector.load %arg1[%c0_79, %c0_80] : memref<9x128xf32, #tpu.memory_space<vmem>>, vector<1x128xf32>
    %95 = vector.broadcast %94 : vector<1x128xf32> to vector<4x128xf32>
    %96 = arith.mulf %93, %95 : vector<4x128xf32>
    %c0_81 = arith.constant 0 : index
    %c0_82 = arith.constant 0 : index
    %97 = vector.load %arg15[%c0_81, %c0_82] : memref<36x128xf32, #tpu.memory_space<vmem>>, vector<4x128xf32>
    tpu.vector_store %arg15[%c0_81, %c0_82], %96 {strides = array<i32>} : memref<36x128xf32, #tpu.memory_space<vmem>>, vector<4x128xf32>,
    %c8_i32_83 = arith.constant 8 : i32
    %98 = tpu.dynamic_rotate %92 by %c8_i32_83 dim 1 : vector<4x128xf32>, i32 -> vector<4x128xf32>
    %c1_84 = arith.constant 1 : index
    %c0_85 = arith.constant 0 : index
    %99 = vector.load %arg1[%c1_84, %c0_85] : memref<9x128xf32, #tpu.memory_space<vmem>>, vector<1x128xf32>
    %100 = vector.broadcast %99 : vector<1x128xf32> to vector<4x128xf32>
    %101 = arith.mulf %98, %100 : vector<4x128xf32>
    %c4_86 = arith.constant 4 : index
    %c0_87 = arith.constant 0 : index
    %102 = vector.load %arg15[%c4_86, %c0_87] : memref<36x128xf32, #tpu.memory_space<vmem>>, vector<4x128xf32>
    tpu.vector_store %arg15[%c4_86, %c0_87], %101 {strides = array<i32>} : memref<36x128xf32, #tpu.memory_space<vmem>>, vector<4x128xf32>,
    %c7_i32_88 = arith.constant 7 : i32
    %103 = tpu.dynamic_rotate %92 by %c7_i32_88 dim 1 : vector<4x128xf32>, i32 -> vector<4x128xf32>
    %c2_89 = arith.constant 2 : index
    %c0_90 = arith.constant 0 : index
    %104 = vector.load %arg1[%c2_89, %c0_90] : memref<9x128xf32, #tpu.memory_space<vmem>>, vector<1x128xf32>
    %105 = vector.broadcast %104 : vector<1x128xf32> to vector<4x128xf32>
    %106 = arith.mulf %103, %105 : vector<4x128xf32>
    %c8_91 = arith.constant 8 : index
    %c0_92 = arith.constant 0 : index
    %107 = vector.load %arg15[%c8_91, %c0_92] : memref<36x128xf32, #tpu.memory_space<vmem>>, vector<4x128xf32>
    tpu.vector_store %arg15[%c8_91, %c0_92], %106 {strides = array<i32>} : memref<36x128xf32, #tpu.memory_space<vmem>>, vector<4x128xf32>,
    %c1_i32_93 = arith.constant 1 : i32
    %108 = tpu.dynamic_rotate %92 by %c1_i32_93 dim 1 : vector<4x128xf32>, i32 -> vector<4x128xf32>
    %c3_94 = arith.constant 3 : index
    %c0_95 = arith.constant 0 : index
    %109 = vector.load %arg1[%c3_94, %c0_95] : memref<9x128xf32, #tpu.memory_space<vmem>>, vector<1x128xf32>
    %110 = vector.broadcast %109 : vector<1x128xf32> to vector<4x128xf32>
    %111 = arith.mulf %108, %110 : vector<4x128xf32>
    %c12_96 = arith.constant 12 : index
    %c0_97 = arith.constant 0 : index
    %112 = vector.load %arg15[%c12_96, %c0_97] : memref<36x128xf32, #tpu.memory_space<vmem>>, vector<4x128xf32>
    tpu.vector_store %arg15[%c12_96, %c0_97], %111 {strides = array<i32>} : memref<36x128xf32, #tpu.memory_space<vmem>>, vector<4x128xf32>,
    %c16_98 = arith.constant 16 : index
    %c0_99 = arith.constant 0 : index
    %113 = vector.load %arg15[%c16_98, %c0_99] : memref<36x128xf32, #tpu.memory_space<vmem>>, vector<4x128xf32>
    tpu.vector_store %arg15[%c16_98, %c0_99], %92 {strides = array<i32>} : memref<36x128xf32, #tpu.memory_space<vmem>>, vector<4x128xf32>,
    %c127_i32_100 = arith.constant 127 : i32
    %114 = tpu.dynamic_rotate %92 by %c127_i32_100 dim 1 : vector<4x128xf32>, i32 -> vector<4x128xf32>
    %c5_101 = arith.constant 5 : index
    %c0_102 = arith.constant 0 : index
    %115 = vector.load %arg1[%c5_101, %c0_102] : memref<9x128xf32, #tpu.memory_space<vmem>>, vector<1x128xf32>
    %116 = vector.broadcast %115 : vector<1x128xf32> to vector<4x128xf32>
    %117 = arith.mulf %114, %116 : vector<4x128xf32>
    %c20_103 = arith.constant 20 : index
    %c0_104 = arith.constant 0 : index
    %118 = vector.load %arg15[%c20_103, %c0_104] : memref<36x128xf32, #tpu.memory_space<vmem>>, vector<4x128xf32>
    tpu.vector_store %arg15[%c20_103, %c0_104], %117 {strides = array<i32>} : memref<36x128xf32, #tpu.memory_space<vmem>>, vector<4x128xf32>,
    %c121_i32_105 = arith.constant 121 : i32
    %119 = tpu.dynamic_rotate %92 by %c121_i32_105 dim 1 : vector<4x128xf32>, i32 -> vector<4x128xf32>
    %c6_106 = arith.constant 6 : index
    %c0_107 = arith.constant 0 : index
    %120 = vector.load %arg1[%c6_106, %c0_107] : memref<9x128xf32, #tpu.memory_space<vmem>>, vector<1x128xf32>
    %121 = vector.broadcast %120 : vector<1x128xf32> to vector<4x128xf32>
    %122 = arith.mulf %119, %121 : vector<4x128xf32>
    %c24_108 = arith.constant 24 : index
    %c0_109 = arith.constant 0 : index
    %123 = vector.load %arg15[%c24_108, %c0_109] : memref<36x128xf32, #tpu.memory_space<vmem>>, vector<4x128xf32>
    tpu.vector_store %arg15[%c24_108, %c0_109], %122 {strides = array<i32>} : memref<36x128xf32, #tpu.memory_space<vmem>>, vector<4x128xf32>,
    %c120_i32_110 = arith.constant 120 : i32
    %124 = tpu.dynamic_rotate %92 by %c120_i32_110 dim 1 : vector<4x128xf32>, i32 -> vector<4x128xf32>
    %c7_111 = arith.constant 7 : index
    %c0_112 = arith.constant 0 : index
    %125 = vector.load %arg1[%c7_111, %c0_112] : memref<9x128xf32, #tpu.memory_space<vmem>>, vector<1x128xf32>
    %126 = vector.broadcast %125 : vector<1x128xf32> to vector<4x128xf32>
    %127 = arith.mulf %124, %126 : vector<4x128xf32>
    %c28_113 = arith.constant 28 : index
    %c0_114 = arith.constant 0 : index
    %128 = vector.load %arg15[%c28_113, %c0_114] : memref<36x128xf32, #tpu.memory_space<vmem>>, vector<4x128xf32>
    tpu.vector_store %arg15[%c28_113, %c0_114], %127 {strides = array<i32>} : memref<36x128xf32, #tpu.memory_space<vmem>>, vector<4x128xf32>,
    %c119_i32_115 = arith.constant 119 : i32
    %129 = tpu.dynamic_rotate %92 by %c119_i32_115 dim 1 : vector<4x128xf32>, i32 -> vector<4x128xf32>
    %c8_116 = arith.constant 8 : index
    %c0_117 = arith.constant 0 : index
    %130 = vector.load %arg1[%c8_116, %c0_117] : memref<9x128xf32, #tpu.memory_space<vmem>>, vector<1x128xf32>
    %131 = vector.broadcast %130 : vector<1x128xf32> to vector<4x128xf32>
    %132 = arith.mulf %129, %131 : vector<4x128xf32>
    %c32_118 = arith.constant 32 : index
    %c0_119 = arith.constant 0 : index
    %133 = vector.load %arg15[%c32_118, %c0_119] : memref<36x128xf32, #tpu.memory_space<vmem>>, vector<4x128xf32>
    tpu.vector_store %arg15[%c32_118, %c0_119], %132 {strides = array<i32>} : memref<36x128xf32, #tpu.memory_space<vmem>>, vector<4x128xf32>,
    %c0_120 = arith.constant 0 : index
    %c0_121 = arith.constant 0 : index
    %134 = vector.load %arg15[%c0_120, %c0_121] : memref<36x128xf32, #tpu.memory_space<vmem>>, vector<36x128xf32>
    %135 = arith.truncf %134 : vector<36x128xf32> to vector<36x128xbf16>
    %c0_122 = arith.constant 0 : index
    %c0_123 = arith.constant 0 : index
    %136 = vector.load %arg6[%c0_122, %c0_123] : memref<4x36xbf16, #tpu.memory_space<vmem>>, vector<4x36xbf16>
    %cst_124 = arith.constant dense<0.000000e+00> : vector<4x128xf32>
    %137 = tpu.matmul %136, %135, %cst_124 {dimension_numbers = #tpu.dot_dimension_numbers<[1], [0], [0], [1], [0, 0, 1, 1], [], []>} : vector<4x36xbf16>, vector<36x128xbf16>, vector<4x128xf32> -> vector<4x128xf32>
    %c0_125 = arith.constant 0 : index
    %c0_126 = arith.constant 0 : index
    %138 = vector.load %arg7[%c0_125, %c0_126] : memref<4x1xf32, #tpu.memory_space<vmem>>, vector<4x1xf32>
    %139 = vector.broadcast %138 : vector<4x1xf32> to vector<4x128xf32>
    %140 = arith.addf %137, %139 : vector<4x128xf32>
    %cst_127 = arith.constant 0.000000e+00 : f32
    %141 = vector.broadcast %cst_127 : f32 to vector<4x128xf32>
    %142 = arith.maximumf %140, %141 : vector<4x128xf32>
    %143 = vector.extract_strided_slice %142 {offsets = [0, 0], sizes = [1, 64], strides = [1, 1]} : vector<4x128xf32> to vector<1x64xf32>
    %c0_128 = arith.constant 0 : index
    %c0_129 = arith.constant 0 : index
    %144 = vector.load %arg16[%c0_128, %c0_129] : memref<2x256xf32, #tpu.memory_space<vmem>>, vector<1x64xf32>
    tpu.vector_store %arg16[%c0_128, %c0_129], %143 {strides = array<i32>} : memref<2x256xf32, #tpu.memory_space<vmem>>, vector<1x64xf32>,
    %145 = vector.extract_strided_slice %142 {offsets = [1, 0], sizes = [1, 64], strides = [1, 1]} : vector<4x128xf32> to vector<1x64xf32>
    %c0_130 = arith.constant 0 : index
    %c64 = arith.constant 64 : index
    %146 = vector.load %arg16[%c0_130, %c64] : memref<2x256xf32, #tpu.memory_space<vmem>>, vector<1x64xf32>
    tpu.vector_store %arg16[%c0_130, %c64], %145 {strides = array<i32>} : memref<2x256xf32, #tpu.memory_space<vmem>>, vector<1x64xf32>,
    %147 = vector.extract_strided_slice %142 {offsets = [2, 0], sizes = [1, 64], strides = [1, 1]} : vector<4x128xf32> to vector<1x64xf32>
    %c0_131 = arith.constant 0 : index
    %c128 = arith.constant 128 : index
    %148 = vector.load %arg16[%c0_131, %c128] : memref<2x256xf32, #tpu.memory_space<vmem>>, vector<1x64xf32>
    tpu.vector_store %arg16[%c0_131, %c128], %147 {strides = array<i32>} : memref<2x256xf32, #tpu.memory_space<vmem>>, vector<1x64xf32>,
    %149 = vector.extract_strided_slice %142 {offsets = [3, 0], sizes = [1, 64], strides = [1, 1]} : vector<4x128xf32> to vector<1x64xf32>
    %c0_132 = arith.constant 0 : index
    %c192 = arith.constant 192 : index
    %150 = vector.load %arg16[%c0_132, %c192] : memref<2x256xf32, #tpu.memory_space<vmem>>, vector<1x64xf32>
    tpu.vector_store %arg16[%c0_132, %c192], %149 {strides = array<i32>} : memref<2x256xf32, #tpu.memory_space<vmem>>, vector<1x64xf32>,
    %151 = vector.extract_strided_slice %142 {offsets = [0, 64], sizes = [1, 64], strides = [1, 1]} : vector<4x128xf32> to vector<1x64xf32>
    %c1_133 = arith.constant 1 : index
    %c0_134 = arith.constant 0 : index
    %152 = vector.load %arg16[%c1_133, %c0_134] : memref<2x256xf32, #tpu.memory_space<vmem>>, vector<1x64xf32>
    tpu.vector_store %arg16[%c1_133, %c0_134], %151 {strides = array<i32>} : memref<2x256xf32, #tpu.memory_space<vmem>>, vector<1x64xf32>,
    %153 = vector.extract_strided_slice %142 {offsets = [1, 64], sizes = [1, 64], strides = [1, 1]} : vector<4x128xf32> to vector<1x64xf32>
    %c1_135 = arith.constant 1 : index
    %c64_136 = arith.constant 64 : index
    %154 = vector.load %arg16[%c1_135, %c64_136] : memref<2x256xf32, #tpu.memory_space<vmem>>, vector<1x64xf32>
    tpu.vector_store %arg16[%c1_135, %c64_136], %153 {strides = array<i32>} : memref<2x256xf32, #tpu.memory_space<vmem>>, vector<1x64xf32>,
    %155 = vector.extract_strided_slice %142 {offsets = [2, 64], sizes = [1, 64], strides = [1, 1]} : vector<4x128xf32> to vector<1x64xf32>
    %c1_137 = arith.constant 1 : index
    %c128_138 = arith.constant 128 : index
    %156 = vector.load %arg16[%c1_137, %c128_138] : memref<2x256xf32, #tpu.memory_space<vmem>>, vector<1x64xf32>
    tpu.vector_store %arg16[%c1_137, %c128_138], %155 {strides = array<i32>} : memref<2x256xf32, #tpu.memory_space<vmem>>, vector<1x64xf32>,
    %157 = vector.extract_strided_slice %142 {offsets = [3, 64], sizes = [1, 64], strides = [1, 1]} : vector<4x128xf32> to vector<1x64xf32>
    %c1_139 = arith.constant 1 : index
    %c192_140 = arith.constant 192 : index
    %158 = vector.load %arg16[%c1_139, %c192_140] : memref<2x256xf32, #tpu.memory_space<vmem>>, vector<1x64xf32>
    tpu.vector_store %arg16[%c1_139, %c192_140], %157 {strides = array<i32>} : memref<2x256xf32, #tpu.memory_space<vmem>>, vector<1x64xf32>,
    %c0_141 = arith.constant 0 : index
    %c0_142 = arith.constant 0 : index
    %159 = vector.load %arg16[%c0_141, %c0_142] : memref<2x256xf32, #tpu.memory_space<vmem>>, vector<2x256xf32>
    %160 = arith.truncf %159 : vector<2x256xf32> to vector<2x256xbf16>
    %c0_143 = arith.constant 0 : index
    %c0_144 = arith.constant 0 : index
    %161 = vector.load %arg8[%c0_143, %c0_144] : memref<256x32xbf16, #tpu.memory_space<vmem>>, vector<256x32xbf16>
    %cst_145 = arith.constant dense<0.000000e+00> : vector<2x32xf32>
    %162 = tpu.matmul %160, %161, %cst_145 {dimension_numbers = #tpu.dot_dimension_numbers<[1], [0], [0], [1], [0, 0, 1, 1], [], []>} : vector<2x256xbf16>, vector<256x32xbf16>, vector<2x32xf32> -> vector<2x32xf32>
    %c0_146 = arith.constant 0 : index
    %c0_147 = arith.constant 0 : index
    %163 = vector.load %arg9[%c0_146, %c0_147] : memref<1x32xf32, #tpu.memory_space<vmem>>, vector<1x32xf32>
    %164 = vector.broadcast %163 : vector<1x32xf32> to vector<2x32xf32>
    %165 = arith.addf %162, %164 : vector<2x32xf32>
    %cst_148 = arith.constant 0.000000e+00 : f32
    %166 = vector.broadcast %cst_148 : f32 to vector<2x32xf32>
    %167 = arith.maximumf %165, %166 : vector<2x32xf32>
    %168 = arith.truncf %167 : vector<2x32xf32> to vector<2x32xbf16>
    %c0_149 = arith.constant 0 : index
    %c0_150 = arith.constant 0 : index
    %169 = vector.load %arg10[%c0_149, %c0_150] : memref<32x32xbf16, #tpu.memory_space<vmem>>, vector<32x32xbf16>
    %cst_151 = arith.constant dense<0.000000e+00> : vector<2x32xf32>
    %170 = tpu.matmul %168, %169, %cst_151 {dimension_numbers = #tpu.dot_dimension_numbers<[1], [0], [0], [1], [0, 0, 1, 1], [], []>} : vector<2x32xbf16>, vector<32x32xbf16>, vector<2x32xf32> -> vector<2x32xf32>
    %c0_152 = arith.constant 0 : index
    %c0_153 = arith.constant 0 : index
    %171 = vector.load %arg11[%c0_152, %c0_153] : memref<1x32xf32, #tpu.memory_space<vmem>>, vector<1x32xf32>
    %172 = vector.broadcast %171 : vector<1x32xf32> to vector<2x32xf32>
    %173 = arith.addf %170, %172 : vector<2x32xf32>
    %cst_154 = arith.constant 0.000000e+00 : f32
    %174 = vector.broadcast %cst_154 : f32 to vector<2x32xf32>
    %175 = arith.maximumf %173, %174 : vector<2x32xf32>
    %176 = arith.truncf %175 : vector<2x32xf32> to vector<2x32xbf16>
    %c0_155 = arith.constant 0 : index
    %c0_156 = arith.constant 0 : index
    %177 = vector.load %arg12[%c0_155, %c0_156] : memref<32x128xbf16, #tpu.memory_space<vmem>>, vector<32x128xbf16>
    %cst_157 = arith.constant dense<0.000000e+00> : vector<2x128xf32>
    %178 = tpu.matmul %176, %177, %cst_157 {dimension_numbers = #tpu.dot_dimension_numbers<[1], [0], [0], [1], [0, 0, 1, 1], [], []>} : vector<2x32xbf16>, vector<32x128xbf16>, vector<2x128xf32> -> vector<2x128xf32>
    %c0_158 = arith.constant 0 : index
    %c0_159 = arith.constant 0 : index
    %179 = vector.load %arg13[%c0_158, %c0_159] : memref<1x128xf32, #tpu.memory_space<vmem>>, vector<1x128xf32>
    %180 = vector.broadcast %179 : vector<1x128xf32> to vector<2x128xf32>
    %181 = arith.addf %178, %180 : vector<2x128xf32>
    %c0_160 = arith.constant 0 : index
    %c0_161 = arith.constant 0 : index
    %182 = vector.load %arg14[%c0_160, %c0_161] : memref<2x128xf32, #tpu.memory_space<vmem>>, vector<2x128xf32>
    tpu.vector_store %arg14[%c0_160, %c0_161], %181 {strides = array<i32>} : memref<2x128xf32, #tpu.memory_space<vmem>>, vector<2x128xf32>,
    return
  }
}

</mosaic_0001>

<bundles_post_ra>
// kernel: minesweeper_cnn_forward.1
= control target key start
LH: loop header
LB: loop body
LE: loop exit
PB: predicated region body
PF: predicated region fallthrough
CT: control target
= control target key end

     0   :  { %s988_s15 = smov 7   ;;  %s989_s16 = smov 9   ;;  %v992_v1 = vmov 0.0   ;;  %vm997_vm0 = vmmov 0   ;;  %v998_v3 = vmov 0   ;;  %s1294_s0 = inlined_call_operand.vmem [shape: f32[1,128], index: 0, kind: input, shape index: {}]   ;;  %s1295_s1 = inlined_call_operand.vmem [shape: f32[9,128], index: 1, kind: input, shape index: {}]   ;;  %s1296_s2 = inlined_call_operand.vmem [shape: bf16[4,9], index: 2, kind: input, shape index: {}]   ;;  %s1297_s3 = inlined_call_operand.vmem [shape: f32[4,1], index: 3, kind: input, shape index: {}]   ;;  %s1298_s4 = inlined_call_operand.vmem [shape: bf16[4,36], index: 4, kind: input, shape index: {}]   ;;  %s1299_s5 = inlined_call_operand.vmem [shape: f32[4,1], index: 5, kind: input, shape index: {}]   ;;  %s1300_s6 = inlined_call_operand.vmem [shape: bf16[4,36], index: 6, kind: input, shape index: {}]   ;;  %s1301_s7 = inlined_call_operand.vmem [shape: f32[4,1], index: 7, kind: input, shape index: {}]   ;;  %s1302_s8 = inlined_call_operand.vmem [shape: bf16[256,32], index: 8, kind: input, shape index: {}]   ;;  %s1303_s9 = inlined_call_operand.vmem [shape: f32[1,32], index: 9, kind: input, shape index: {}]   ;;  %s1304_s10 = inlined_call_operand.vmem [shape: bf16[32,32], index: 10, kind: input, shape index: {}]   ;;  %s1305_s11 = inlined_call_operand.vmem [shape: f32[1,32], index: 11, kind: input, shape index: {}]   ;;  %s1306_s12 = inlined_call_operand.vmem [shape: bf16[32,128], index: 12, kind: input, shape index: {}]   ;;  %s1307_s13 = inlined_call_operand.vmem [shape: f32[1,128], index: 13, kind: input, shape index: {}]   ;;  %s1308_s14 = inlined_call_operand.hbm [shape: f32[2,128], index: 14, kind: output, shape index: {}]  }
   0x1   :  { %v49_v0 = vld [vmem:[%s1294_s0] sm:$0x1]  ;;  %s990_s17 = smov 1   ;;  %s991_s18 = smov 8   ;;  %887 = vmatprep.subr.bf16.mxu0 %v992_v1  ;;  %893 = vmatprep.subr.bf16.mxu1 %v992_v1 }
   0x2   :  { %60 = vrot.lane.b32.xlu1 %v49_v0, %s988_s15  ;;  %70 = vst [vmem:[#allocation2 + $0x4] sm:$0x1] %v49_v0  ;;  %50 = vrot.lane.b32.xlu0 %v49_v0, %s989_s16  ;;  %s993_s19 = smov 121   ;;  %s994_s0 = smov 127   ;;  %v95_v2 = vld [vmem:[%s1297_s3] sm:$0xf] }
   0x3   :  { %s995_s20 = smov 119   ;;  %s996_s21 = smov 120   ;;  %889 = vmatprep.mubr.msk.bf16.mxu0 %vm997_vm0, %v992_v1  ;;  %899 = vmatprep.mubr.msk.bf16.mxu1 %vm997_vm0, %v992_v1 }
   0x4   :  { %944 = vset.pattern.permute.xlu0 %v998_v3  ;;  %945 = vset.pattern.permute.xlu1 %v998_v3 }
   0x6   :  { %65 = vrot.lane.b32.xlu1 %v49_v0, %s990_s17  ;;  %55 = vrot.lane.b32.xlu0 %v49_v0, %s991_s18 }
   0xa   :  { %76 = vrot.lane.b32.xlu1 %v49_v0, %s993_s19  ;;  %71 = vrot.lane.b32.xlu0 %v49_v0, %s994_s0 }
   0xe   :  { %86 = vrot.lane.b32.xlu1 %v49_v0, %s995_s20  ;;  %81 = vrot.lane.b32.xlu0 %v49_v0, %s996_s21 }
  0x12   :  { %98 = vperm.xlu0 %944, %v95_v2  }
  0x13   :  { %19 = vsyncpa [#allocation5], 0  ;;  %v62_v4 = vld [vmem:[%s1295_s1 + $0x2] sm:$0x1]  ;;  %v52_v5 = vld [vmem:[%s1295_s1] sm:$0x1] }
  0x14   :  { %v67_v10 = vld [vmem:[%s1295_s1 + $0x3] sm:$0x1]  ;;  %v57_v11 = vld [vmem:[%s1295_s1 + $0x1] sm:$0x1]  ;;  %v78_v16 = vld [vmem:[%s1295_s1 + $0x6] sm:$0x1] }
  0x15   :  { %v73_v17 = vld [vmem:[%s1295_s1 + $0x5] sm:$0x1]  ;;  %v88_v22 = vld [vmem:[%s1295_s1 + $0x8] sm:$0x1]  ;;  %v83_v23 = vld [vmem:[%s1295_s1 + $0x7] sm:$0x1] }
  0x16   :  { %vm105_vm1 = vcmask 1043456   ;;  %vm106_vm2 = vcmask 1044480   ;;  %v999_v28 = vmov 65535   ;;  %v94_v35 = vld [vmem:[%s1296_s2] sm:$0x3]  ;;  %vm101_vm3 = vcmask 72704  }
  0x17   :  { %v107_v29 = vsel %vm105_vm1, 4294967295, %v999_v28  ;;  %v235_v43 = vld [vmem:[%s1299_s5] sm:$0xf]  ;;  %v1142_v44 = vld [vmem:[%s1295_s1 + $0x6] ss:$0 sm:$0xff]  ;;  %vm245_vm4 = vcmask 1041408  }
  0x18   :  { %v108_v32 = vsel %vm106_vm2, %v107_v29, 0  ;;  %v1147_v45 = vld [vmem:[%s1295_s1 + $0x8] ss:$0 sm:$0xff]  ;;  %v1154_v50 = vld [vmem:[%s1295_s1] ss:$0 sm:$0xff]  ;;  %vm241_vm5 = vcmask 293888  }
  0x19   :  { %v1159_v51 = vld [vmem:[%s1295_s1 + $0x5] ss:$0 sm:$0xff]  ;;  %v1166_v56 = vld [vmem:[%s1295_s1 + $0x2] ss:$0 sm:$0xff]  ;;  %v811_v57 = vld [vmem:[%s1295_s1 + $0x7] ss:$0 sm:$0xff] }
  0x1a   :  { %v806_v62 = vld [vmem:[%s1295_s1 + $0x1] ss:$0 sm:$0xff]  ;;  %vm425_vm6 = vcmask 516096   ;;  %s1001_s28 = smov 64   ;;  %vm440_vm7 = vcmask 1040896   ;;  %vm677_vm8 = vcmask 261120  }
  0x74   :  { %v61_v6 = vpop.permute.xlu1 %60  ;;  %v51_v7 = vpop.permute.xlu0 %50 }
  0x75   :  { %v63_v8 = vmul.f32 %v62_v4, %v61_v6  ;;  %v53_v9 = vmul.f32 %v52_v5, %v51_v7  ;;  %v808_v5 = vld [vmem:[%s1295_s1 + $0x3] ss:$0 sm:$0xff]  ;;  %s1002_s1 = smov [#allocation4]  }
  0x77   :  { %64 = vst [vmem:[#allocation2 + $0x2] sm:$0x1] %v63_v8  ;;  %54 = vst [vmem:[#allocation2] sm:$0x1] %v53_v9 }
  0x78   :  { %v66_v12 = vpop.permute.xlu1 %65  ;;  %v56_v13 = vpop.permute.xlu0 %55 }
  0x79   :  { %v68_v14 = vmul.f32 %v67_v10, %v66_v12  ;;  %v58_v15 = vmul.f32 %v57_v11, %v56_v13 }
  0x7b   :  { %69 = vst [vmem:[#allocation2 + $0x3] sm:$0x1] %v68_v14  ;;  %59 = vst [vmem:[#allocation2 + $0x1] sm:$0x1] %v58_v15  ;;  %v234_v14 = vld [vmem:[%s1298_s4] sm:$0x3] }
  0x7c   :  { %v77_v18 = vpop.permute.xlu1 %76  ;;  %v72_v19 = vpop.permute.xlu0 %71 }
  0x7d   :  { %v79_v20 = vmul.f32 %v78_v16, %v77_v18  ;;  %v74_v21 = vmul.f32 %v73_v17, %v72_v19 }
  0x7f   :  { %80 = vst [vmem:[#allocation2 + $0x6] sm:$0x1] %v79_v20  ;;  %75 = vst [vmem:[#allocation2 + $0x5] sm:$0x1] %v74_v21 }
  0x80   :  { %v87_v24 = vpop.permute.xlu1 %86  ;;  %v82_v25 = vpop.permute.xlu0 %81 }
  0x81   :  { %v89_v26 = vmul.f32 %v88_v22, %v87_v24  ;;  %v84_v27 = vmul.f32 %v83_v23, %v82_v25  ;;  %v372_v22 = vld [vmem:[%s1301_s7] sm:$0xf] }
  0x83   :  { %90 = vst [vmem:[#allocation2 + $0x8] sm:$0x1] %v89_v26  ;;  %85 = vst [vmem:[#allocation2 + $0x7] sm:$0x1] %v84_v27 }
  0x8a   :  { %v91_v30 = vld [vmem:[#allocation2] sm:$0xff]  ;;  %v92_v31 = vld [vmem:[#allocation2 + $0x8] sm:$0x1] }
  0x8b   :  { %v93_v33 = vpack.c.bf16 %v92_v31, %v91_v30 }
  0x8d   :  { %v110_v34 = vand.u32 %v108_v32, %v93_v33  ;;  %v99_v36 = vpop.permute.xlu0 %98 }
  0x8f   :  { %888 = vmatpush3.bf16.msra.mxu0 %v110_v34 }
  0x90   :  { %903 = vmatprep.subr.bf16.mxu0 %v992_v1 }
  0x92   :  { %890 = vmatmul.mubr.msk.bf16.vlgmr.msra.gmra.mxu0 %vm101_vm3, %v94_v35 }
  0x93   :  { %909 = vmatprep.mubr.msk.bf16.mxu0 %vm997_vm0, %v992_v1 }
 0x152   :  { %v146_v37 = vpop.f32.mrf.mxu0 }
 0x153   :  { %v147_v38 = vadd.f32 %v146_v37, %v99_v36 }
 0x154   :  { %v891_v39 = vpop.f32.mrf.mxu0 }
 0x155   :  { %v152_v40 = vmax.f32 %v147_v38, 0.0 }
 0x156   :  { %v149_v41 = vpop.f32.mrf.mxu0 }
 0x157   :  { %189 = vst [vmem:[#allocation2 + $0x10] sm:$0xf] %v152_v40  ;;  %199 = vrot.lane.b32.xlu0 %v152_v40, %s993_s19  ;;  %217 = vrot.lane.b32.xlu1 %v152_v40, %s995_s20 }
 0x158   :  { %v892_v42 = vpop.f32.mrf.mxu0 }
 0x15b   :  { %153 = vrot.lane.b32.xlu0 %v152_v40, %s989_s16  ;;  %190 = vrot.lane.b32.xlu1 %v152_v40, %s994_s0 }
 0x15f   :  { %171 = vrot.lane.b32.xlu0 %v152_v40, %s988_s15  ;;  %208 = vrot.lane.b32.xlu1 %v152_v40, %s996_s21 }
 0x163   :  { %238 = vperm.xlu0 %944, %v235_v43   ;;  %162 = vrot.lane.b32.xlu1 %v152_v40, %s991_s18 }
 0x167   :  { %180 = vrot.lane.b32.xlu1 %v152_v40, %s990_s17 }
 0x1c9   :  { %v200_v46 = vpop.permute.xlu0 %199  ;;  %v218_v47 = vpop.permute.xlu1 %217 }
 0x1ca   :  { %v206_v48 = vmul.f32 %v1142_v44, %v200_v46  ;;  %v224_v49 = vmul.f32 %v1147_v45, %v218_v47 }
 0x1cc   :  { %207 = vst [vmem:[#allocation2 + $0x18] sm:$0xf] %v206_v48  ;;  %225 = vst [vmem:[#allocation2 + $0x20] sm:$0xf] %v224_v49  ;;  %v371_v48 = vld [vmem:[%s1300_s6] sm:$0x3] }
 0x1cd   :  { %v154_v52 = vpop.permute.xlu0 %153  ;;  %v191_v53 = vpop.permute.xlu1 %190  ;;  %v946_v49 = vld [vmem:[%s1302_s8 + $0x78] sm:$0xff]  }
 0x1ce   :  { %v160_v54 = vmul.f32 %v1154_v50, %v154_v52  ;;  %v197_v55 = vmul.f32 %v1159_v51, %v191_v53  ;;  %v949_v52 = vld [vmem:[%s1302_s8 + $0x30] sm:$0xff]   ;;  %v950_v53 = vld [vmem:[%s1302_s8 + $0x68] sm:$0xff]  }
 0x1d0   :  { %161 = vst [vmem:[#allocation2] sm:$0xf] %v160_v54  ;;  %198 = vst [vmem:[#allocation2 + $0x14] sm:$0xf] %v197_v55  ;;  %v951_v54 = vld [vmem:[%s1302_s8 + $0x28] sm:$0xff]   ;;  %v952_v55 = vld [vmem:[%s1302_s8 + $0x60] sm:$0xff]  }
 0x1d1   :  { %v172_v58 = vpop.permute.xlu0 %171  ;;  %v209_v59 = vpop.permute.xlu1 %208 }
 0x1d2   :  { %v178_v60 = vmul.f32 %v1166_v56, %v172_v58  ;;  %v215_v61 = vmul.f32 %v811_v57, %v209_v59  ;;  %v431_v59 = vlaneseq }
 0x1d3   :  { %v230_v63 = vld [vmem:[#allocation2 + $0x20] sm:$0xf] }
 0x1d4   :  { %179 = vst [vmem:[#allocation2 + $0x8] sm:$0xf] %v178_v60  ;;  %216 = vst [vmem:[#allocation2 + $0x1c] sm:$0xf] %v215_v61  ;;  %v233_v0 = vpack.c.bf16 %v230_v63, %v230_v63  ;;  %v954_v60 = vld [vmem:[%s1302_s8 + $0x58] sm:$0xff]   ;;  %v432_v63 = vshrl.u32 %v431_v59, 7 }
 0x1d5   :  { %v163_v2 = vpop.permute.xlu1 %162  ;;  %v955_v61 = vld [vmem:[%s1302_s8 + $0x18] sm:$0xff]  }
 0x1d6   :  { %v169_v3 = vmul.f32 %v806_v62, %v163_v2  ;;  %v247_v4 = vsel %vm245_vm4, %v233_v0, 0  ;;  %v956_v2 = vld [vmem:[%s1302_s8 + $0x50] sm:$0xff]  }
 0x1d7   :  { %894 = vmatpush3.bf16.msra.mxu1 %v247_v4  ;;  %v228_v8 = vld [vmem:[#allocation2 + $0x10] sm:$0xff] }
 0x1d8   :  { %170 = vst [vmem:[#allocation2 + $0x4] sm:$0xf] %v169_v3  ;;  %895 = vmatprep.subr.bf16.mxu1 %v992_v1  ;;  %v957_v4 = vld [vmem:[%s1302_s8 + $0x10] sm:$0xff]  }
 0x1d9   :  { %v181_v6 = vpop.permute.xlu1 %180 }
 0x1da   :  { %v187_v7 = vmul.f32 %v808_v5, %v181_v6 }
 0x1db   :  { %v229_v9 = vld [vmem:[#allocation2 + $0x18] sm:$0xff] }
 0x1dc   :  { %188 = vst [vmem:[#allocation2 + $0xc] sm:$0xf] %v187_v7  ;;  %v232_v10 = vpack.c.bf16 %v229_v9, %v228_v8  ;;  %v959_v9 = vld [vmem:[%s1302_s8 + $0x8] sm:$0xff]  }
 0x1de   :  { %896 = vmatpush3.bf16.msra.mxu1 %v232_v10  ;;  %v239_v15 = vpop.permute.xlu0 %238 }
 0x1df   :  { %897 = vmatprep.subr.bf16.mxu1 %v992_v1  ;;  %v226_v11 = vld [vmem:[#allocation2] sm:$0xff] }
 0x1e3   :  { %v227_v12 = vld [vmem:[#allocation2 + $0x8] sm:$0xff] }
 0x1e4   :  { %v231_v13 = vpack.c.bf16 %v227_v12, %v226_v11  ;;  %v960_v11 = vld [vmem:[%s1302_s8 + $0x40] sm:$0xff]  }
 0x1e6   :  { %898 = vmatpush3.bf16.msra.mxu1 %v231_v13 }
 0x1e7   :  { %859 = vmatprep.subr.bf16.mxu1 %v946_v49 }
 0x1e9   :  { %900 = vmatmul.mubr.msk.bf16.vlgmr.msra.gmra.mxu1 %vm241_vm5, %v234_v14 }
 0x2a9   :  { %v283_v16 = vpop.f32.mrf.mxu1 }
 0x2aa   :  { %v284_v17 = vadd.f32 %v283_v16, %v239_v15  ;;  %v961_v15 = vld [vmem:[%s1302_s8] sm:$0xff]  }
 0x2ab   :  { %v901_v18 = vpop.f32.mrf.mxu1 }
 0x2ac   :  { %v289_v19 = vmax.f32 %v284_v17, 0.0 }
 0x2ad   :  { %v286_v20 = vpop.f32.mrf.mxu1 }
 0x2ae   :  { %326 = vst [vmem:[#allocation2 + $0x10] sm:$0xf] %v289_v19  ;;  %327 = vrot.lane.b32.xlu0 %v289_v19, %s994_s0  ;;  %354 = vrot.lane.b32.xlu1 %v289_v19, %s995_s20 }
 0x2af   :  { %v902_v21 = vpop.f32.mrf.mxu1 }
 0x2b2   :  { %345 = vrot.lane.b32.xlu0 %v289_v19, %s996_s21  ;;  %336 = vrot.lane.b32.xlu1 %v289_v19, %s993_s19 }
 0x2b6   :  { %299 = vrot.lane.b32.xlu0 %v289_v19, %s991_s18  ;;  %290 = vrot.lane.b32.xlu1 %v289_v19, %s989_s16 }
 0x2ba   :  { %317 = vrot.lane.b32.xlu0 %v289_v19, %s990_s17  ;;  %308 = vrot.lane.b32.xlu1 %v289_v19, %s988_s15 }
 0x2be   :  { %375 = vperm.xlu1 %945, %v372_v22  }
 0x320   :  { %v328_v23 = vpop.permute.xlu0 %327  ;;  %v355_v24 = vpop.permute.xlu1 %354 }
 0x321   :  { %v334_v25 = vmul.f32 %v1159_v51, %v328_v23  ;;  %v361_v26 = vmul.f32 %v1147_v45, %v355_v24  ;;  %v948_v51 = vld [vmem:[%s1302_s8 + $0x70] sm:$0xff]  }
 0x323   :  { %335 = vst [vmem:[#allocation2 + $0x14] sm:$0xf] %v334_v25  ;;  %362 = vst [vmem:[#allocation2 + $0x20] sm:$0xf] %v361_v26 }
 0x324   :  { %v346_v27 = vpop.permute.xlu0 %345  ;;  %v337_v28 = vpop.permute.xlu1 %336 }
 0x325   :  { %v352_v29 = vmul.f32 %v811_v57, %v346_v27  ;;  %v343_v30 = vmul.f32 %v1142_v44, %v337_v28  ;;  %v1000_v57 = vmov 1983009808  }
 0x326   :  { %v429_v58 = vunpack.c.l.s4 %v1000_v57 }
 0x327   :  { %353 = vst [vmem:[#allocation2 + $0x1c] sm:$0xf] %v352_v29  ;;  %344 = vst [vmem:[#allocation2 + $0x18] sm:$0xf] %v343_v30  ;;  %v962_v29 = vld [vmem:[%s1304_s10 + $0x8] sm:$0xff]   ;;  %v963_v30 = vld [vmem:[%s1304_s10] sm:$0xff]  }
 0x328   :  { %v300_v31 = vpop.permute.xlu0 %299  ;;  %v291_v32 = vpop.permute.xlu1 %290 }
 0x329   :  { %v306_v33 = vmul.f32 %v806_v62, %v300_v31  ;;  %v297_v34 = vmul.f32 %v1154_v50, %v291_v32  ;;  %v947_v50 = vld [vmem:[%s1302_s8 + $0x38] sm:$0xff]   ;;  %v430_v62 = vunpack.c.0.s8 %v429_v58  ;;  %v824_v32 = vld [vmem:[%s1303_s9] ss:$0 sm:$0xff] }
 0x32a   :  { %v367_v35 = vld [vmem:[#allocation2 + $0x20] sm:$0xf]  ;;  %v365_v42 = vld [vmem:[#allocation2 + $0x10] sm:$0xff]  ;;  %860 = vmatpush3.bf16.msra.mxu1 %v947_v50 }
 0x32b   :  { %307 = vst [vmem:[#allocation2 + $0x4] sm:$0xf] %v306_v33  ;;  %298 = vst [vmem:[#allocation2] sm:$0xf] %v297_v34  ;;  %v370_v36 = vpack.c.bf16 %v367_v35, %v367_v35  ;;  %861 = vmatprep.subr.bf16.mxu1 %v948_v51  ;;  %v433_v7 = vsub.s32 %v430_v62, %v432_v63 }
 0x32c   :  { %v318_v37 = vpop.permute.xlu0 %317  ;;  %v309_v38 = vpop.permute.xlu1 %308 }
 0x32d   :  { %v324_v39 = vmul.f32 %v808_v5, %v318_v37  ;;  %v315_v40 = vmul.f32 %v1166_v56, %v309_v38  ;;  %v382_v41 = vsel %vm245_vm4, %v370_v36, 0  ;;  %v953_v56 = vld [vmem:[%s1302_s8 + $0x20] sm:$0xff]   ;;  %v958_v5 = vld [vmem:[%s1302_s8 + $0x48] sm:$0xff]  }
 0x32e   :  { %904 = vmatpush3.bf16.msra.mxu0 %v382_v41  ;;  %v366_v43 = vld [vmem:[#allocation2 + $0x18] sm:$0xff]  ;;  %862 = vmatpush3.bf16.msra.mxu1 %v949_v52  ;;  %v965_v41 = vld [vmem:[%s1306_s12] sm:$0xff]  }
 0x32f   :  { %325 = vst [vmem:[#allocation2 + $0xc] sm:$0xf] %v324_v39  ;;  %316 = vst [vmem:[#allocation2 + $0x8] sm:$0xf] %v315_v40  ;;  %905 = vmatprep.subr.bf16.mxu0 %v992_v1  ;;  %v369_v44 = vpack.c.bf16 %v366_v43, %v365_v42  ;;  %863 = vmatprep.subr.bf16.mxu1 %v950_v53  ;;  %v964_v39 = vld [vmem:[%s1306_s12 + $0x8] sm:$0xff]   ;;  %s796_s12 = sshll.u32 %s1002_s1, 4  ;;  %s797_s12 = int_to_ptr.vmem [resolvable:$true] %s796_s12 }
 0x330   :  { %v841_v42 = vld [vmem:[%s1305_s11] ss:$0 sm:$0xff]  ;;  %s966_s11 = scalar_lea.vmem %s797_s12, 32  ;;  %p971_p1 = scmp.lt.s32.totalorder %s797_s12, %s797_s12 }
 0x331   :  { %p967_p0 = scmp.ne.s32.totalorder %s797_s12, %s966_s11  ;;  %p972_p2 = scmp.lt.s32.totalorder %s966_s11, %s966_s11 }
 0x332   :  { %906 = vmatpush3.bf16.msra.mxu0 %v369_v44  ;;  %v363_v45 = vld [vmem:[#allocation2] sm:$0xff]  ;;  %864 = vmatpush3.bf16.msra.mxu1 %v951_v54 }
 0x333   :  { %907 = vmatprep.subr.bf16.mxu0 %v992_v1  ;;  %865 = vmatprep.subr.bf16.mxu1 %v952_v55  ;;  %p973_p3 = por %p972_p2, %p971_p1 }
 0x335   :  { %p974_p4 = pnand %p973_p3, %p967_p0 }
 0x336   :  { %v364_v46 = vld [vmem:[#allocation2 + $0x8] sm:$0xff]  ;;  %866 = vmatpush3.bf16.msra.mxu1 %v953_v56 }
 0x337   :  { %v368_v47 = vpack.c.bf16 %v364_v46, %v363_v45  ;;  %867 = vmatprep.subr.bf16.mxu1 %v954_v60 }
 0x339   :  { %908 = vmatpush3.bf16.msra.mxu0 %v368_v47  ;;  %v376_v0 = vpop.permute.xlu1 %375 }
 0x33a   :  { %913 = vmatprep.subr.bf16.mxu0 %v992_v1  ;;  %868 = vmatpush3.bf16.msra.mxu1 %v955_v61 }
 0x33b   :  { %869 = vmatprep.subr.bf16.mxu1 %v956_v2 }
 0x33c   :  { %910 = vmatmul.mubr.msk.bf16.vlgmr.msra.gmra.mxu0 %vm241_vm5, %v371_v48 }
 0x33d   :  { %917 = vmatprep.mubr.msk.bf16.mxu0 %vm997_vm0, %v992_v1  ;;  %914 = vmatpush3.bf16.msra.mxu0 %v962_v29 }
 0x33e   :  { %870 = vmatpush3.bf16.msra.mxu1 %v957_v4  ;;  %915 = vmatprep.subr.bf16.mxu0 %v992_v1 }
 0x33f   :  { %871 = vmatprep.subr.bf16.mxu1 %v958_v5 }
 0x341   :  { %916 = vmatpush3.bf16.msra.mxu0 %v963_v30 }
 0x342   :  { %872 = vmatpush3.bf16.msra.mxu1 %v959_v9  ;;  %921 = vmatprep.subr.bf16.mxu0 %v992_v1 }
 0x343   :  { %873 = vmatprep.subr.bf16.mxu1 %v960_v11 }
 0x346   :  { %874 = vmatpush3.bf16.msra.mxu1 %v961_v15 }
 0x3fc   :  { %v418_v3 = vpop.f32.mrf.mxu0 }
 0x3fd   :  { %v419_v6 = vadd.f32 %v418_v3, %v376_v0 }
 0x3fe   :  { %v911_v8 = vpop.f32.mrf.mxu0 }
 0x3ff   :  { %v424_v10 = vmax.f32 %v419_v6, 0.0 }
 0x400   :  { %v421_v12 = vpop.f32.mrf.mxu0 }
 0x401   :  { %426 = vst.msk [vmem:[#allocation3] sm:$0x1] %vm425_vm6, %v424_v10  ;;  %v434_v13 = vrot.slane %v424_v10, %v433_v7 }
 0x402   :  { %v912_v14 = vpop.f32.mrf.mxu0 }
 0x403   :  { %451 = vrot.lane.b32.xlu0 %v434_v13, %s1001_s28  ;;  %v442_v16 = vcombine.high %v434_v13, %v434_v13  ;;  %v435_v17 = vrot.slane %v434_v13, 7 }
 0x405   :  { %457 = vrot.lane.b32.xlu1 %v442_v16, %s1001_s28  ;;  %444 = vst.msk [vmem:[#allocation3 + $0x2] sm:$0x1] %vm425_vm6, %v442_v16  ;;  %v436_v18 = vrot.slane %v435_v17, 2  ;;  %v445_v19 = vrot.slane %v442_v16, 7 }
 0x407   :  { %437 = vrot.lane.b32.xlu0 %v436_v18, %s1001_s28  ;;  %v446_v20 = vrot.slane %v445_v19, 2 }
 0x409   :  { %447 = vrot.lane.b32.xlu1 %v446_v20, %s1001_s28 }
 0x475   :  { %v452_v21 = vpop.permute.xlu0 %451 }
 0x476   :  { %454 = vst.msk [vmem:[#allocation3 + $0x1] sm:$0x1] %vm425_vm6, %v452_v21 }
 0x477   :  { %456 = vst.msk [vmem:[#allocation3 + $0x1] sm:$0x1] %vm440_vm7, %v436_v18  ;;  %v458_v22 = vpop.permute.xlu1 %457 }
 0x478   :  { %460 = vst.msk [vmem:[#allocation3 + $0x3] sm:$0x1] %vm425_vm6, %v458_v22 }
 0x479   :  { %462 = vst.msk [vmem:[#allocation3 + $0x3] sm:$0x1] %vm440_vm7, %v446_v20  ;;  %v438_v23 = vpop.permute.xlu0 %437 }
 0x47a   :  { %441 = vst.msk [vmem:[#allocation3] sm:$0x1] %vm440_vm7, %v438_v23 }
 0x47b   :  { %v448_v24 = vpop.permute.xlu1 %447 }
 0x47c   :  { %450 = vst.msk [vmem:[#allocation3 + $0x2] sm:$0x1] %vm440_vm7, %v448_v24 }
 0x483   :  { %v823_v25 = vld.sshfl [vmem:[#allocation3] sm:$0x33 pattern:$0x76325410] }
 0x484   :  { %v472_v26 = vcombine.high %v823_v25, %v823_v25  ;;  %v475_v28 = vpack.c.bf16 %v823_v25, %v823_v25 }
 0x486   :  { %v476_v27 = vpack.c.bf16 %v472_v26, %v472_v26 }
 0x488   :  { %644 = vmatprep.mubr.bf16.mxu1 %v476_v27 }
 0x489   :  { %645 = vmatmul.mubr.bf16.vlgmr.msra.gmra.mxu1 %v475_v28 }
 0x549   :  { %v875_v31 = vpop.f32.mrf.mxu1 }
 0x54b   :  { %v876_v33 = vpop.f32.mrf.mxu1 }
 0x54c   :  { %v877_v34 = vadd.f32 %v876_v33, %v875_v31 }
 0x54d   :  { %v878_v35 = vpop.f32.mrf.mxu1 }
 0x54e   :  { %v647_v36 = vadd.f32 %v877_v34, %v824_v32 }
 0x54f   :  { %v879_v37 = vpop.f32.mrf.mxu1 }
 0x550   :  { %v652_v38 = vmax.f32 %v647_v36, 0.0 }
 0x552   :  { %v653_v40 = vpack.c.bf16 %v652_v38, %v652_v38 }
 0x554   :  { %918 = vmatmul.mubr.msk.bf16.vlgmr.msra.gmra.mxu0 %vm677_vm8, %v653_v40 }
 0x555   :  { %922 = vmatpush3.bf16.msra.mxu0 %v964_v39  ;;  %925 = vmatprep.mubr.msk.bf16.mxu0 %vm997_vm0, %v992_v1 }
 0x556   :  { %923 = vmatprep.subr.bf16.mxu0 %v992_v1  ;;  %v845_v1 = vld [vmem:[%s1307_s13] ss:$0 sm:$0xff] }
 0x559   :  { %924 = vmatpush3.bf16.msra.mxu0 %v965_v41 }
 0x614   :  { %v715_v43 = vpop.f32.mrf.mxu0 }
 0x615   :  { %v716_v44 = vadd.f32 %v841_v42, %v715_v43 }
 0x616   :  { %v919_v45 = vpop.f32.mrf.mxu0 }
 0x617   :  { %v721_v46 = vmax.f32 %v716_v44, 0.0 }
 0x618   :  { %v718_v47 = vpop.f32.mrf.mxu0 }
 0x619   :  { %v722_v48 = vpack.c.bf16 %v721_v46, %v721_v46 }
 0x61a   :  { %v920_v49 = vpop.f32.mrf.mxu0 }
 0x61b   :  { %926 = vmatmul.mubr.msk.bf16.vlgmr.msra.gmra.mxu0 %vm677_vm8, %v722_v48 }
 0x6db   :  { %v783_v50 = vpop.f32.mrf.mxu0 }
 0x6dc   :  { %v784_v51 = vadd.f32 %v845_v1, %v783_v50 }
 0x6dd   :  { %v927_v52 = vpop.f32.mrf.mxu0 }
 0x6de   :  { %789 = vst [vmem:[#allocation4] sm:$0x3] %v784_v51 }
 0x6df   :  { %v786_v53 = vpop.f32.mrf.mxu0 }
 0x6e0   :  { %977 = shalt.err (!%p974_p4)
}
 0x6e1   :  { %799 = dma.vmem_to_hbm [thread:$0]  %s797_s12, 32, %s1308_s14, [#allocation5]   ;;  %v928_v54 = vpop.f32.mrf.mxu0 }
 0x6e2   :  { %986 = dma.done.wait [#allocation5], 32  }
 0x6e3   :  { %987 = vsyncadd [#allocation5], 4294967264 }
 0x6e4   :  { %803 = vsyncpa [#allocation5], 1 }

</bundles_post_ra>
